<compile_context>
chip_gen: v7x
topology: tpu7x:2x2x1
jax: 0.10.0
libtpu: 0.0.40
codegen_flags: <defaults>
</compile_context>

<pallas_src>
import functools
import math

import numpy as np
import jax
import jax.numpy as jnp
from jax.experimental import pallas as pl
from jax.experimental.pallas import tpu as pltpu


def _erf(z):
    # Abramowitz & Stegun 7.1.26, |error| <= 1.5e-7 (matches exact nn.GELU to ~1e-7).
    a1, a2, a3, a4, a5 = 0.254829592, -0.284496736, 1.421413741, -1.453152027, 1.061405429
    p = 0.3275911
    az = jnp.abs(z)
    t = 1.0 / (1.0 + p * az)
    poly = ((((a5 * t + a4) * t + a3) * t + a2) * t + a1) * t
    r = 1.0 - poly * jnp.exp(-az * az)
    return jnp.where(z < 0, -r, r)


def _layer_norm(v, g, b, eps=1e-5):
    mu = jnp.mean(v, axis=-1, keepdims=True)
    var = jnp.mean(jnp.square(v - mu), axis=-1, keepdims=True)
    return (v - mu) * jax.lax.rsqrt(var + eps) * g + b


def se_transformer_kernel(x_ref, g0_ref, b0_ref, g1_ref, b1_ref,
                          wqkv_ref, w1_ref, bf1_ref, w2_ref, bf2_ref,
                          hmask_ref, summat_ref, o_ref,
                          *, num_head, matmul_dtype, approx_recip):
    f32 = jnp.float32
    md = matmul_dtype
    Bb, T, D = x_ref.shape
    H = num_head
    dh = D // H
    R = Bb * T

    # (Bb, T, D) -> (Bb*T, D): leading-dim merge only (layout-preserving, cheap).
    x = x_ref[...].astype(f32).reshape(R, D)
    g0, b0 = g0_ref[...], b0_ref[...]
    g1, b1 = g1_ref[...], b1_ref[...]

    h1 = _layer_norm(x, g0, b0)                  # block-level self.norm(x)
    hn = _layer_norm(h1, g1, b1)                 # mhsa.norm(h1), shared by q/k/v

    # Fused QKV projection: one (R, D) x (D, 3D) matmul with f32 accumulation.
    qkv = jnp.dot(hn.astype(md), wqkv_ref[...], preferred_element_type=f32)
    scale = 1.0 / math.sqrt(dh)
    q3 = (qkv[:, :D] * scale).reshape(Bb, T, D)
    k3 = qkv[:, D:2 * D].reshape(Bb, T, D)
    v3 = qkv[:, 2 * D:].reshape(Bb, T, D)

    # Block-diagonal head trick: K~[b, h*T + m, :] = k[b, m, :] * head_mask[h], so the
    # per-head scores for ALL heads come from a single batched matmul, and P @ V~
    # reassembles the heads with no per-head slicing / concatenation.
    hmask = hmask_ref[...]                                         # (HT, D), 0/1
    k_t = jnp.concatenate([k3] * H, axis=1) * hmask                # (Bb, HT, D)
    v_t = jnp.concatenate([v3] * H, axis=1) * hmask                # (Bb, HT, D)

    s = jnp.einsum("bnd,bmd->bnm", q3.astype(md), k_t.astype(md),
                   preferred_element_type=f32)                     # (Bb, T, HT)
    # Softmax over keys within each head block.  A row-wide max is a valid stabilizer
    # (softmax is shift-invariant); per-head denominators are gathered and broadcast
    # back with one (HT, HT) 0/1 matmul instead of reshapes / lane slices.
    s = s - jnp.max(s, axis=-1, keepdims=True)
    e = jnp.exp(s).reshape(R, H * T)
    denom = jnp.dot(e.astype(md), summat_ref[...], preferred_element_type=f32)
    p = (e * pl.reciprocal(denom, approx=approx_recip)).reshape(Bb, T, H * T)

    y = jnp.einsum("bnm,bmd->bnd", p.astype(md), v_t.astype(md),
                   preferred_element_type=f32).reshape(R, D)
    # TODO(synk): attention dropout (p=0.5) treated as identity (eval mode).

    x2 = x + h1 + y                              # x + mhsa(self.norm(x))

    # Feed-forward: linear1 -> exact (erf) GELU -> linear2, block norm reused.
    h2 = _layer_norm(x2, g0, b0)
    f = jnp.dot(h2.astype(md), w1_ref[...], preferred_element_type=f32) + bf1_ref[...]
    f = 0.5 * f * (1.0 + _erf(f * (1.0 / math.sqrt(2.0))))
    # TODO(synk): ffn dropout (p=0.5) treated as identity (eval mode).
    f = jnp.dot(f.astype(md), w2_ref[...], preferred_element_type=f32) + bf2_ref[...]

    o_ref[...] = (x2 + f).reshape(Bb, T, D).astype(o_ref.dtype)


def _pick_b_blk(B, T, target_rows=1024):
    """Largest divisor of B whose fused row count fits the target; prefer an even grid
    (>= 2 steps) so both v7x TensorCores get work once blocks are big enough."""
    divisors = [d for d in range(1, B + 1) if B % d == 0]
    fits = [d for d in divisors if d * T <= target_rows] or [1]
    best = max(fits)
    if B // best < 2:
        even = [d for d in fits if (B // d) >= 2 and (B // d) % 2 == 0 and d * T >= 256]
        if even:
            best = max(even)
    return best


def se_transformer_block(x, params, *, num_head=4, b_blk=None,
                         matmul_dtype=jnp.bfloat16, approx_softmax=True):
    """x: (B, T, D).  params use PyTorch layouts (nn.Linear weight is (out, in))."""
    B, T, D = x.shape
    F = params["w1"].shape[0]
    H = num_head
    assert D % H == 0, "latent_dim must be divisible by num_head"
    dh = D // H
    HT = H * T
    f32 = jnp.float32
    md = matmul_dtype

    if b_blk is None:
        b_blk = _pick_b_blk(B, T)
    assert B % b_blk == 0
    grid = (B // b_blk,)

    # Kernel-friendly parameter layouts (pre-transposed so `h @ w == h @ W^T`);
    # matmul operands in `matmul_dtype`, LN params / biases stay f32.
    g0 = params["norm_g"].reshape(1, D).astype(f32)
    b0 = params["norm_b"].reshape(1, D).astype(f32)
    g1 = params["mhsa_norm_g"].reshape(1, D).astype(f32)
    b1 = params["mhsa_norm_b"].reshape(1, D).astype(f32)
    wqkv_t = jnp.concatenate(
        [params["wq"].T, params["wk"].T, params["wv"].T], axis=1).astype(md)   # (D, 3D)
    w1_t = params["w1"].T.astype(md)                                           # (D, F)
    bf1 = params["b1"].reshape(1, F).astype(f32)
    w2_t = params["w2"].T.astype(md)                                           # (F, D)
    bf2 = params["b2"].reshape(1, D).astype(f32)

    # Constant 0/1 matrices for the block-diagonal head trick (built host-side).
    j = np.arange(HT)
    hmask = jnp.asarray(j[:, None] // T == np.arange(D)[None, :] // dh, f32)   # (HT, D)
    summat = jnp.asarray(j[:, None] // T == j[None, :] // T, md)               # (HT, HT)

    const = lambda b: (0, 0)
    kernel = functools.partial(se_transformer_kernel, num_head=H,
                               matmul_dtype=md, approx_recip=approx_softmax)

    return pl.pallas_call(
        kernel,
        out_shape=jax.ShapeDtypeStruct((B, T, D), x.dtype),
        grid_spec=pltpu.PrefetchScalarGridSpec(
            num_scalar_prefetch=0,
            grid=grid,
            in_specs=[
                pl.BlockSpec((b_blk, T, D), lambda b: (b, 0, 0)),              # x
                pl.BlockSpec((1, D), const), pl.BlockSpec((1, D), const),      # block LN
                pl.BlockSpec((1, D), const), pl.BlockSpec((1, D), const),      # mhsa LN
                pl.BlockSpec((D, 3 * D), const),                               # Wqkv^T
                pl.BlockSpec((D, F), const), pl.BlockSpec((1, F), const),      # W1^T, b1
                pl.BlockSpec((F, D), const), pl.BlockSpec((1, D), const),      # W2^T, b2
                pl.BlockSpec((HT, D), const),                                  # head mask
                pl.BlockSpec((HT, HT), const),                                 # head-sum mat
            ],
            out_specs=pl.BlockSpec((b_blk, T, D), lambda b: (b, 0, 0)),
        ),
        compiler_params=pltpu.CompilerParams(
            dimension_semantics=("parallel",),   # shard fused-batch steps over v7x TCs
        ),
    )(x, g0, b0, g1, b1, wqkv_t, w1_t, bf1, w2_t, bf2, hmask, summat)


def reference(x, params, *, num_head=4):
    """Pure-JAX (XLA, f32, highest matmul precision) reference of the PyTorch forward."""
    B, T, D = x.shape
    H = num_head
    dh = D // H
    hi = jax.lax.Precision.HIGHEST

    def ln(v, g, b):
        mu = jnp.mean(v, axis=-1, keepdims=True)
        var = jnp.mean(jnp.square(v - mu), axis=-1, keepdims=True)
        return (v - mu) * jax.lax.rsqrt(var + 1e-5) * g + b

    g0, b0 = params["norm_g"], params["norm_b"]
    g1, b1 = params["mhsa_norm_g"], params["mhsa_norm_b"]

    h1 = ln(x, g0, b0)
    hn = ln(h1, g1, b1)
    q = jnp.einsum("btd,od->bto", hn, params["wq"], precision=hi).reshape(B, T, H, dh)
    k = jnp.einsum("btd,od->bto", hn, params["wk"], precision=hi).reshape(B, T, H, dh)
    v = jnp.einsum("btd,od->bto", hn, params["wv"], precision=hi).reshape(B, T, H, dh)
    att = jnp.einsum("bnhd,bmhd->bnmh", q, k, precision=hi) / math.sqrt(dh)
    w = jax.nn.softmax(att, axis=2)
    y = jnp.einsum("bnmh,bmhd->bnhd", w, v, precision=hi).reshape(B, T, D)
    x2 = x + h1 + y

    h2 = ln(x2, g0, b0)
    f = jnp.einsum("btd,fd->btf", h2, params["w1"], precision=hi) + params["b1"]
    f = jax.nn.gelu(f, approximate=False)
    f = jnp.einsum("btf,df->btd", f, params["w2"], precision=hi) + params["b2"]
    return x2 + f


if __name__ == "__main__":
    # Module defaults: latent_dim=32, ffn_dim=256, num_head=4; small B, T for the demo.
    B, T, D, F, H = 2, 8, 32, 256, 4

    key = jax.random.PRNGKey(0)
    keys = jax.random.split(key, 12)
    x = jax.random.normal(keys[0], (B, T, D), dtype=jnp.float32)

    # Random (non-zero) parameters so the test exercises the full math path (PyTorch
    # zero-inits ffn.linear2, but the kernel must be correct for arbitrary weights).
    params = {
        "norm_g": 1.0 + 0.1 * jax.random.normal(keys[1], (D,), jnp.float32),
        "norm_b": 0.1 * jax.random.normal(keys[2], (D,), jnp.float32),
        "mhsa_norm_g": 1.0 + 0.1 * jax.random.normal(keys[3], (D,), jnp.float32),
        "mhsa_norm_b": 0.1 * jax.random.normal(keys[4], (D,), jnp.float32),
        "wq": 0.2 * jax.random.normal(keys[5], (D, D), jnp.float32),
        "wk": 0.2 * jax.random.normal(keys[6], (D, D), jnp.float32),
        "wv": 0.2 * jax.random.normal(keys[7], (D, D), jnp.float32),
        "w1": 0.2 * jax.random.normal(keys[8], (F, D), jnp.float32),
        "b1": 0.1 * jax.random.normal(keys[9], (F,), jnp.float32),
        "w2": 0.2 * jax.random.normal(keys[10], (D, F), jnp.float32),
        "b2": 0.1 * jax.random.normal(keys[11], (D,), jnp.float32),
    }

    ref = reference(x, params, num_head=H)

    # 1) f32-operand parity path: checks the fused math against the PyTorch-equivalent
    #    reference (tolerance covers erf-poly and MXU multi-pass f32 rounding).
    out_f32 = jax.block_until_ready(
        se_transformer_block(x, params, num_head=H,
                             matmul_dtype=jnp.float32, approx_softmax=False))
    assert out_f32.shape == (B, T, D)
    err_f32 = float(jnp.max(jnp.abs(out_f32 - ref)))
    assert jnp.allclose(out_f32, ref, atol=1e-3, rtol=1e-3), f"f32 path mismatch: {err_f32}"

    # 2) Default fast path: bf16 MXU operands (f32 accumulation) + EUP approx reciprocal.
    #    Tolerance reflects bf16 operand rounding (~2^-9 relative) vs the f32 reference.
    out_fast = jax.block_until_ready(se_transformer_block(x, params, num_head=H))
    assert out_fast.shape == (B, T, D)
    err_fast = float(jnp.max(jnp.abs(out_fast - ref)))
    assert jnp.allclose(out_fast, ref, atol=2.5e-1, rtol=5e-2), f"bf16 path mismatch: {err_fast}"

    print("KERNEL_OK")
</pallas_src>

<mosaic_0001>
module attributes {stable_mosaic.version = 11 : i64} {
  func.func @se_transformer_kernel(%arg0: i32, %arg1: memref<2x8x32xf32, #tpu.memory_space<vmem>>, %arg2: memref<1x32xf32, #tpu.memory_space<vmem>>, %arg3: memref<1x32xf32, #tpu.memory_space<vmem>>, %arg4: memref<1x32xf32, #tpu.memory_space<vmem>>, %arg5: memref<1x32xf32, #tpu.memory_space<vmem>>, %arg6: memref<32x96xf32, #tpu.memory_space<vmem>>, %arg7: memref<32x256xf32, #tpu.memory_space<vmem>>, %arg8: memref<1x256xf32, #tpu.memory_space<vmem>>, %arg9: memref<256x32xf32, #tpu.memory_space<vmem>>, %arg10: memref<1x32xf32, #tpu.memory_space<vmem>>, %arg11: memref<32x32xf32, #tpu.memory_space<vmem>>, %arg12: memref<32x32xf32, #tpu.memory_space<vmem>>, %arg13: memref<2x8x32xf32, #tpu.memory_space<vmem>>) attributes {dimension_semantics = [#tpu.dimension_semantics<parallel>], iteration_bounds = array<i64: 1>, scalar_prefetch = 0 : i64, scratch_operands = 0 : i64, tpu.core_type = #tpu.core_type<tc>, window_params = [{transform_indices = @transform_0, window_bounds = array<i64: 2, 8, 32>}, {pipeline_mode = #tpu.pipeline_mode<synchronous>, transform_indices = @transform_1, window_bounds = array<i64: 1, 32>}, {pipeline_mode = #tpu.pipeline_mode<synchronous>, transform_indices = @transform_2, window_bounds = array<i64: 1, 32>}, {pipeline_mode = #tpu.pipeline_mode<synchronous>, transform_indices = @transform_3, window_bounds = array<i64: 1, 32>}, {pipeline_mode = #tpu.pipeline_mode<synchronous>, transform_indices = @transform_4, window_bounds = array<i64: 1, 32>}, {pipeline_mode = #tpu.pipeline_mode<synchronous>, transform_indices = @transform_5, window_bounds = array<i64: 32, 96>}, {pipeline_mode = #tpu.pipeline_mode<synchronous>, transform_indices = @transform_6, window_bounds = array<i64: 32, 256>}, {pipeline_mode = #tpu.pipeline_mode<synchronous>, transform_indices = @transform_7, window_bounds = array<i64: 1, 256>}, {pipeline_mode = #tpu.pipeline_mode<synchronous>, transform_indices = @transform_8, window_bounds = array<i64: 256, 32>}, {pipeline_mode = #tpu.pipeline_mode<synchronous>, transform_indices = @transform_9, window_bounds = array<i64: 1, 32>}, {pipeline_mode = #tpu.pipeline_mode<synchronous>, transform_indices = @transform_10, window_bounds = array<i64: 32, 32>}, {pipeline_mode = #tpu.pipeline_mode<synchronous>, transform_indices = @transform_11, window_bounds = array<i64: 32, 32>}, {transform_indices = @transform_12, window_bounds = array<i64: 2, 8, 32>}]} {
    %c0 = arith.constant 0 : index
    %c0_0 = arith.constant 0 : index
    %c0_1 = arith.constant 0 : index
    %0 = vector.load %arg1[%c0, %c0_0, %c0_1] : memref<2x8x32xf32, #tpu.memory_space<vmem>>, vector<2x8x32xf32>
    %1 = vector.shape_cast %0 : vector<2x8x32xf32> to vector<16x32xf32>
    %c0_2 = arith.constant 0 : index
    %c0_3 = arith.constant 0 : index
    %2 = vector.load %arg2[%c0_2, %c0_3] : memref<1x32xf32, #tpu.memory_space<vmem>>, vector<1x32xf32>
    %c0_4 = arith.constant 0 : index
    %c0_5 = arith.constant 0 : index
    %3 = vector.load %arg3[%c0_4, %c0_5] : memref<1x32xf32, #tpu.memory_space<vmem>>, vector<1x32xf32>
    %c0_6 = arith.constant 0 : index
    %c0_7 = arith.constant 0 : index
    %4 = vector.load %arg4[%c0_6, %c0_7] : memref<1x32xf32, #tpu.memory_space<vmem>>, vector<1x32xf32>
    %c0_8 = arith.constant 0 : index
    %c0_9 = arith.constant 0 : index
    %5 = vector.load %arg5[%c0_8, %c0_9] : memref<1x32xf32, #tpu.memory_space<vmem>>, vector<1x32xf32>
    %cst = arith.constant dense<0.000000e+00> : vector<16xf32>
    %6 = vector.multi_reduction <add>, %1, %cst [1] : vector<16x32xf32> to vector<16xf32>
    %7 = vector.shape_cast %6 : vector<16xf32> to vector<16x1xf32>
    %cst_10 = arith.constant 3.200000e+01 : f32
    %8 = vector.broadcast %cst_10 : f32 to vector<16x1xf32>
    %9 = arith.divf %7, %8 : vector<16x1xf32>
    %10 = vector.broadcast %9 : vector<16x1xf32> to vector<16x32xf32>
    %11 = arith.subf %1, %10 : vector<16x32xf32>
    %12 = arith.mulf %11, %11 : vector<16x32xf32>
    %cst_11 = arith.constant dense<0.000000e+00> : vector<16xf32>
    %13 = vector.multi_reduction <add>, %12, %cst_11 [1] : vector<16x32xf32> to vector<16xf32>
    %14 = vector.shape_cast %13 : vector<16xf32> to vector<16x1xf32>
    %cst_12 = arith.constant 3.200000e+01 : f32
    %15 = vector.broadcast %cst_12 : f32 to vector<16x1xf32>
    %16 = arith.divf %14, %15 : vector<16x1xf32>
    %17 = vector.broadcast %9 : vector<16x1xf32> to vector<16x32xf32>
    %18 = arith.subf %1, %17 : vector<16x32xf32>
    %cst_13 = arith.constant 9.99999974E-6 : f32
    %19 = vector.broadcast %cst_13 : f32 to vector<16x1xf32>
    %20 = arith.addf %16, %19 : vector<16x1xf32>
    %21 = math.rsqrt %20 : vector<16x1xf32>
    %22 = vector.broadcast %21 : vector<16x1xf32> to vector<16x32xf32>
    %23 = arith.mulf %18, %22 : vector<16x32xf32>
    %24 = vector.broadcast %2 : vector<1x32xf32> to vector<16x32xf32>
    %25 = arith.mulf %23, %24 : vector<16x32xf32>
    %26 = vector.broadcast %3 : vector<1x32xf32> to vector<16x32xf32>
    %27 = arith.addf %25, %26 : vector<16x32xf32>
    %cst_14 = arith.constant dense<0.000000e+00> : vector<16xf32>
    %28 = vector.multi_reduction <add>, %27, %cst_14 [1] : vector<16x32xf32> to vector<16xf32>
    %29 = vector.shape_cast %28 : vector<16xf32> to vector<16x1xf32>
    %cst_15 = arith.constant 3.200000e+01 : f32
    %30 = vector.broadcast %cst_15 : f32 to vector<16x1xf32>
    %31 = arith.divf %29, %30 : vector<16x1xf32>
    %32 = vector.broadcast %31 : vector<16x1xf32> to vector<16x32xf32>
    %33 = arith.subf %27, %32 : vector<16x32xf32>
    %34 = arith.mulf %33, %33 : vector<16x32xf32>
    %cst_16 = arith.constant dense<0.000000e+00> : vector<16xf32>
    %35 = vector.multi_reduction <add>, %34, %cst_16 [1] : vector<16x32xf32> to vector<16xf32>
    %36 = vector.shape_cast %35 : vector<16xf32> to vector<16x1xf32>
    %cst_17 = arith.constant 3.200000e+01 : f32
    %37 = vector.broadcast %cst_17 : f32 to vector<16x1xf32>
    %38 = arith.divf %36, %37 : vector<16x1xf32>
    %39 = vector.broadcast %31 : vector<16x1xf32> to vector<16x32xf32>
    %40 = arith.subf %27, %39 : vector<16x32xf32>
    %cst_18 = arith.constant 9.99999974E-6 : f32
    %41 = vector.broadcast %cst_18 : f32 to vector<16x1xf32>
    %42 = arith.addf %38, %41 : vector<16x1xf32>
    %43 = math.rsqrt %42 : vector<16x1xf32>
    %44 = vector.broadcast %43 : vector<16x1xf32> to vector<16x32xf32>
    %45 = arith.mulf %40, %44 : vector<16x32xf32>
    %46 = vector.broadcast %4 : vector<1x32xf32> to vector<16x32xf32>
    %47 = arith.mulf %45, %46 : vector<16x32xf32>
    %48 = vector.broadcast %5 : vector<1x32xf32> to vector<16x32xf32>
    %49 = arith.addf %47, %48 : vector<16x32xf32>
    %c0_19 = arith.constant 0 : index
    %c0_20 = arith.constant 0 : index
    %50 = vector.load %arg6[%c0_19, %c0_20] : memref<32x96xf32, #tpu.memory_space<vmem>>, vector<32x96xf32>
    %cst_21 = arith.constant dense<0.000000e+00> : vector<16x96xf32>
    %51 = tpu.matmul %49, %50, %cst_21 {dimension_numbers = #tpu.dot_dimension_numbers<[1], [0], [0], [1], [0, 0, 1, 1], [], []>} : vector<16x32xf32>, vector<32x96xf32>, vector<16x96xf32> -> vector<16x96xf32>
    %52 = vector.extract_strided_slice %51 {offsets = [0, 0], sizes = [16, 32], strides = [1, 1]} : vector<16x96xf32> to vector<16x32xf32>
    %cst_22 = arith.constant 0.353553385 : f32
    %53 = vector.broadcast %cst_22 : f32 to vector<16x32xf32>
    %54 = arith.mulf %52, %53 : vector<16x32xf32>
    %55 = vector.shape_cast %54 : vector<16x32xf32> to vector<2x8x32xf32>
    %56 = vector.extract_strided_slice %51 {offsets = [0, 32], sizes = [16, 32], strides = [1, 1]} : vector<16x96xf32> to vector<16x32xf32>
    %57 = vector.shape_cast %56 : vector<16x32xf32> to vector<2x8x32xf32>
    %58 = vector.extract_strided_slice %51 {offsets = [0, 64], sizes = [16, 32], strides = [1, 1]} : vector<16x96xf32> to vector<16x32xf32>
    %59 = vector.shape_cast %58 : vector<16x32xf32> to vector<2x8x32xf32>
    %c0_23 = arith.constant 0 : index
    %c0_24 = arith.constant 0 : index
    %60 = vector.load %arg11[%c0_23, %c0_24] : memref<32x32xf32, #tpu.memory_space<vmem>>, vector<32x32xf32>
    %61 = tpu.concatenate %57, %57, %57, %57 in 1 : vector<2x8x32xf32>, vector<2x8x32xf32>, vector<2x8x32xf32>, vector<2x8x32xf32> -> vector<2x32x32xf32>
    %62 = vector.shape_cast %60 : vector<32x32xf32> to vector<1x32x32xf32>
    %63 = vector.broadcast %62 : vector<1x32x32xf32> to vector<2x32x32xf32>
    %64 = arith.mulf %61, %63 : vector<2x32x32xf32>
    %65 = tpu.concatenate %59, %59, %59, %59 in 1 : vector<2x8x32xf32>, vector<2x8x32xf32>, vector<2x8x32xf32>, vector<2x8x32xf32> -> vector<2x32x32xf32>
    %66 = vector.shape_cast %60 : vector<32x32xf32> to vector<1x32x32xf32>
    %67 = vector.broadcast %66 : vector<1x32x32xf32> to vector<2x32x32xf32>
    %68 = arith.mulf %65, %67 : vector<2x32x32xf32>
    "tpu.trace_start"() <{level = 10 : i32, message = "bnd,bmd->bnm"}> : () -> ()
    %cst_25 = arith.constant dense<0.000000e+00> : vector<2x8x32xf32>
    %69 = tpu.matmul %55, %64, %cst_25 {dimension_numbers = #tpu.dot_dimension_numbers<[2], [2], [1], [1], [0, 0, 0, 1, 1, 1], [0], [0]>} : vector<2x8x32xf32>, vector<2x32x32xf32>, vector<2x8x32xf32> -> vector<2x8x32xf32>
    "tpu.trace_stop"() : () -> ()
    %cst_26 = arith.constant dense<0xFF800000> : vector<2x8xf32>
    %70 = vector.multi_reduction <maximumf>, %69, %cst_26 [2] : vector<2x8x32xf32> to vector<2x8xf32>
    %71 = vector.shape_cast %70 : vector<2x8xf32> to vector<2x8x1xf32>
    %72 = vector.broadcast %71 : vector<2x8x1xf32> to vector<2x8x32xf32>
    %73 = arith.subf %69, %72 : vector<2x8x32xf32>
    %74 = math.exp %73 : vector<2x8x32xf32>
    %75 = vector.shape_cast %74 : vector<2x8x32xf32> to vector<16x32xf32>
    %c0_27 = arith.constant 0 : index
    %c0_28 = arith.constant 0 : index
    %76 = vector.load %arg12[%c0_27, %c0_28] : memref<32x32xf32, #tpu.memory_space<vmem>>, vector<32x32xf32>
    %cst_29 = arith.constant dense<0.000000e+00> : vector<16x32xf32>
    %77 = tpu.matmul %75, %76, %cst_29 {dimension_numbers = #tpu.dot_dimension_numbers<[1], [0], [0], [1], [0, 0, 1, 1], [], []>} : vector<16x32xf32>, vector<32x32xf32>, vector<16x32xf32> -> vector<16x32xf32>
    %78 = tpu.reciprocal %77 : vector<16x32xf32> -> vector<16x32xf32>
    %79 = arith.mulf %75, %78 : vector<16x32xf32>
    %80 = vector.shape_cast %79 : vector<16x32xf32> to vector<2x8x32xf32>
    "tpu.trace_start"() <{level = 10 : i32, message = "bnm,bmd->bnd"}> : () -> ()
    %cst_30 = arith.constant dense<0.000000e+00> : vector<2x8x32xf32>
    %81 = tpu.matmul %80, %68, %cst_30 {dimension_numbers = #tpu.dot_dimension_numbers<[2], [1], [1], [2], [0, 0, 0, 1, 1, 2], [0], [0]>} : vector<2x8x32xf32>, vector<2x32x32xf32>, vector<2x8x32xf32> -> vector<2x8x32xf32>
    "tpu.trace_stop"() : () -> ()
    %82 = vector.shape_cast %81 : vector<2x8x32xf32> to vector<16x32xf32>
    %83 = arith.addf %1, %27 : vector<16x32xf32>
    %84 = arith.addf %83, %82 : vector<16x32xf32>
    %cst_31 = arith.constant dense<0.000000e+00> : vector<16xf32>
    %85 = vector.multi_reduction <add>, %84, %cst_31 [1] : vector<16x32xf32> to vector<16xf32>
    %86 = vector.shape_cast %85 : vector<16xf32> to vector<16x1xf32>
    %cst_32 = arith.constant 3.200000e+01 : f32
    %87 = vector.broadcast %cst_32 : f32 to vector<16x1xf32>
    %88 = arith.divf %86, %87 : vector<16x1xf32>
    %89 = vector.broadcast %88 : vector<16x1xf32> to vector<16x32xf32>
    %90 = arith.subf %84, %89 : vector<16x32xf32>
    %91 = arith.mulf %90, %90 : vector<16x32xf32>
    %cst_33 = arith.constant dense<0.000000e+00> : vector<16xf32>
    %92 = vector.multi_reduction <add>, %91, %cst_33 [1] : vector<16x32xf32> to vector<16xf32>
    %93 = vector.shape_cast %92 : vector<16xf32> to vector<16x1xf32>
    %cst_34 = arith.constant 3.200000e+01 : f32
    %94 = vector.broadcast %cst_34 : f32 to vector<16x1xf32>
    %95 = arith.divf %93, %94 : vector<16x1xf32>
    %96 = vector.broadcast %88 : vector<16x1xf32> to vector<16x32xf32>
    %97 = arith.subf %84, %96 : vector<16x32xf32>
    %cst_35 = arith.constant 9.99999974E-6 : f32
    %98 = vector.broadcast %cst_35 : f32 to vector<16x1xf32>
    %99 = arith.addf %95, %98 : vector<16x1xf32>
    %100 = math.rsqrt %99 : vector<16x1xf32>
    %101 = vector.broadcast %100 : vector<16x1xf32> to vector<16x32xf32>
    %102 = arith.mulf %97, %101 : vector<16x32xf32>
    %103 = vector.broadcast %2 : vector<1x32xf32> to vector<16x32xf32>
    %104 = arith.mulf %102, %103 : vector<16x32xf32>
    %105 = vector.broadcast %3 : vector<1x32xf32> to vector<16x32xf32>
    %106 = arith.addf %104, %105 : vector<16x32xf32>
    %c0_36 = arith.constant 0 : index
    %c0_37 = arith.constant 0 : index
    %107 = vector.load %arg7[%c0_36, %c0_37] : memref<32x256xf32, #tpu.memory_space<vmem>>, vector<32x256xf32>
    %cst_38 = arith.constant dense<0.000000e+00> : vector<16x256xf32>
    %108 = tpu.matmul %106, %107, %cst_38 {dimension_numbers = #tpu.dot_dimension_numbers<[1], [0], [0], [1], [0, 0, 1, 1], [], []>} : vector<16x32xf32>, vector<32x256xf32>, vector<16x256xf32> -> vector<16x256xf32>
    %c0_39 = arith.constant 0 : index
    %c0_40 = arith.constant 0 : index
    %109 = vector.load %arg8[%c0_39, %c0_40] : memref<1x256xf32, #tpu.memory_space<vmem>>, vector<1x256xf32>
    %110 = vector.broadcast %109 : vector<1x256xf32> to vector<16x256xf32>
    %111 = arith.addf %108, %110 : vector<16x256xf32>
    %cst_41 = arith.constant 5.000000e-01 : f32
    %112 = vector.broadcast %cst_41 : f32 to vector<16x256xf32>
    %113 = arith.mulf %112, %111 : vector<16x256xf32>
    %cst_42 = arith.constant 0.707106769 : f32
    %114 = vector.broadcast %cst_42 : f32 to vector<16x256xf32>
    %115 = arith.mulf %111, %114 : vector<16x256xf32>
    %116 = math.absf %115 : vector<16x256xf32>
    %cst_43 = arith.constant 0.327591091 : f32
    %117 = vector.broadcast %cst_43 : f32 to vector<16x256xf32>
    %118 = arith.mulf %117, %116 : vector<16x256xf32>
    %cst_44 = arith.constant 1.000000e+00 : f32
    %119 = vector.broadcast %cst_44 : f32 to vector<16x256xf32>
    %120 = arith.addf %119, %118 : vector<16x256xf32>
    %cst_45 = arith.constant 1.000000e+00 : f32
    %121 = vector.broadcast %cst_45 : f32 to vector<16x256xf32>
    %122 = arith.divf %121, %120 : vector<16x256xf32>
    %cst_46 = arith.constant 1.06140542 : f32
    %123 = vector.broadcast %cst_46 : f32 to vector<16x256xf32>
    %124 = arith.mulf %123, %122 : vector<16x256xf32>
    %cst_47 = arith.constant -1.45315206 : f32
    %125 = vector.broadcast %cst_47 : f32 to vector<16x256xf32>
    %126 = arith.addf %124, %125 : vector<16x256xf32>
    %127 = arith.mulf %126, %122 : vector<16x256xf32>
    %cst_48 = arith.constant 1.42141378 : f32
    %128 = vector.broadcast %cst_48 : f32 to vector<16x256xf32>
    %129 = arith.addf %127, %128 : vector<16x256xf32>
    %130 = arith.mulf %129, %122 : vector<16x256xf32>
    %cst_49 = arith.constant -0.284496725 : f32
    %131 = vector.broadcast %cst_49 : f32 to vector<16x256xf32>
    %132 = arith.addf %130, %131 : vector<16x256xf32>
    %133 = arith.mulf %132, %122 : vector<16x256xf32>
    %cst_50 = arith.constant 0.254829586 : f32
    %134 = vector.broadcast %cst_50 : f32 to vector<16x256xf32>
    %135 = arith.addf %133, %134 : vector<16x256xf32>
    %136 = arith.mulf %135, %122 : vector<16x256xf32>
    %cst_51 = arith.constant 0.000000e+00 : f32
    %137 = vector.broadcast %cst_51 : f32 to vector<16x256xf32>
    %138 = arith.subf %137, %116 : vector<16x256xf32>
    %139 = arith.mulf %138, %116 : vector<16x256xf32>
    %140 = math.exp %139 : vector<16x256xf32>
    %141 = arith.mulf %136, %140 : vector<16x256xf32>
    %cst_52 = arith.constant 1.000000e+00 : f32
    %142 = vector.broadcast %cst_52 : f32 to vector<16x256xf32>
    %143 = arith.subf %142, %141 : vector<16x256xf32>
    %cst_53 = arith.constant 0.000000e+00 : f32
    %144 = vector.broadcast %cst_53 : f32 to vector<16x256xf32>
    %145 = arith.cmpf olt, %115, %144 : vector<16x256xf32>
    %cst_54 = arith.constant 0.000000e+00 : f32
    %146 = vector.broadcast %cst_54 : f32 to vector<16x256xf32>
    %147 = arith.subf %146, %143 : vector<16x256xf32>
    %148 = arith.select %145, %147, %143 : vector<16x256xi1>, vector<16x256xf32>
    %cst_55 = arith.constant 1.000000e+00 : f32
    %149 = vector.broadcast %cst_55 : f32 to vector<16x256xf32>
    %150 = arith.addf %149, %148 : vector<16x256xf32>
    %151 = arith.mulf %113, %150 : vector<16x256xf32>
    %c0_56 = arith.constant 0 : index
    %c0_57 = arith.constant 0 : index
    %152 = vector.load %arg9[%c0_56, %c0_57] : memref<256x32xf32, #tpu.memory_space<vmem>>, vector<256x32xf32>
    %cst_58 = arith.constant dense<0.000000e+00> : vector<16x32xf32>
    %153 = tpu.matmul %151, %152, %cst_58 {dimension_numbers = #tpu.dot_dimension_numbers<[1], [0], [0], [1], [0, 0, 1, 1], [], []>} : vector<16x256xf32>, vector<256x32xf32>, vector<16x32xf32> -> vector<16x32xf32>
    %c0_59 = arith.constant 0 : index
    %c0_60 = arith.constant 0 : index
    %154 = vector.load %arg10[%c0_59, %c0_60] : memref<1x32xf32, #tpu.memory_space<vmem>>, vector<1x32xf32>
    %155 = vector.broadcast %154 : vector<1x32xf32> to vector<16x32xf32>
    %156 = arith.addf %153, %155 : vector<16x32xf32>
    %157 = arith.addf %84, %156 : vector<16x32xf32>
    %158 = vector.shape_cast %157 : vector<16x32xf32> to vector<2x8x32xf32>
    %c0_61 = arith.constant 0 : index
    %c0_62 = arith.constant 0 : index
    %c0_63 = arith.constant 0 : index
    %159 = vector.load %arg13[%c0_61, %c0_62, %c0_63] : memref<2x8x32xf32, #tpu.memory_space<vmem>>, vector<2x8x32xf32>
    tpu.vector_store %arg13[%c0_61, %c0_62, %c0_63], %158 {strides = array<i32>} : memref<2x8x32xf32, #tpu.memory_space<vmem>>, vector<2x8x32xf32>,
    return
  }
  func.func @transform_0(%arg0: i32) -> (i32, i32, i32) {
    %c0_i32 = arith.constant 0 : i32
    %c0_i32_0 = arith.constant 0 : i32
    %c0_i32_1 = arith.constant 0 : i32
    return %arg0, %c0_i32, %c0_i32_0 : i32, i32, i32
  }
  func.func @transform_1(%arg0: i32) -> (i32, i32) {
    %c0_i32 = arith.constant 0 : i32
    %c0_i32_0 = arith.constant 0 : i32
    %c0_i32_1 = arith.constant 0 : i32
    return %c0_i32, %c0_i32_0 : i32, i32
  }
  func.func @transform_2(%arg0: i32) -> (i32, i32) {
    %c0_i32 = arith.constant 0 : i32
    %c0_i32_0 = arith.constant 0 : i32
    %c0_i32_1 = arith.constant 0 : i32
    return %c0_i32, %c0_i32_0 : i32, i32
  }
  func.func @transform_3(%arg0: i32) -> (i32, i32) {
    %c0_i32 = arith.constant 0 : i32
    %c0_i32_0 = arith.constant 0 : i32
    %c0_i32_1 = arith.constant 0 : i32
    return %c0_i32, %c0_i32_0 : i32, i32
  }
  func.func @transform_4(%arg0: i32) -> (i32, i32) {
    %c0_i32 = arith.constant 0 : i32
    %c0_i32_0 = arith.constant 0 : i32
    %c0_i32_1 = arith.constant 0 : i32
    return %c0_i32, %c0_i32_0 : i32, i32
  }
  func.func @transform_5(%arg0: i32) -> (i32, i32) {
    %c0_i32 = arith.constant 0 : i32
    %c0_i32_0 = arith.constant 0 : i32
    %c0_i32_1 = arith.constant 0 : i32
    return %c0_i32, %c0_i32_0 : i32, i32
  }
  func.func @transform_6(%arg0: i32) -> (i32, i32) {
    %c0_i32 = arith.constant 0 : i32
    %c0_i32_0 = arith.constant 0 : i32
    %c0_i32_1 = arith.constant 0 : i32
    return %c0_i32, %c0_i32_0 : i32, i32
  }
  func.func @transform_7(%arg0: i32) -> (i32, i32) {
    %c0_i32 = arith.constant 0 : i32
    %c0_i32_0 = arith.constant 0 : i32
    %c0_i32_1 = arith.constant 0 : i32
    return %c0_i32, %c0_i32_0 : i32, i32
  }
  func.func @transform_8(%arg0: i32) -> (i32, i32) {
    %c0_i32 = arith.constant 0 : i32
    %c0_i32_0 = arith.constant 0 : i32
    %c0_i32_1 = arith.constant 0 : i32
    return %c0_i32, %c0_i32_0 : i32, i32
  }
  func.func @transform_9(%arg0: i32) -> (i32, i32) {
    %c0_i32 = arith.constant 0 : i32
    %c0_i32_0 = arith.constant 0 : i32
    %c0_i32_1 = arith.constant 0 : i32
    return %c0_i32, %c0_i32_0 : i32, i32
  }
  func.func @transform_10(%arg0: i32) -> (i32, i32) {
    %c0_i32 = arith.constant 0 : i32
    %c0_i32_0 = arith.constant 0 : i32
    %c0_i32_1 = arith.constant 0 : i32
    return %c0_i32, %c0_i32_0 : i32, i32
  }
  func.func @transform_11(%arg0: i32) -> (i32, i32) {
    %c0_i32 = arith.constant 0 : i32
    %c0_i32_0 = arith.constant 0 : i32
    %c0_i32_1 = arith.constant 0 : i32
    return %c0_i32, %c0_i32_0 : i32, i32
  }
  func.func @transform_12(%arg0: i32) -> (i32, i32, i32) {
    %c0_i32 = arith.constant 0 : i32
    %c0_i32_0 = arith.constant 0 : i32
    %c0_i32_1 = arith.constant 0 : i32
    return %arg0, %c0_i32, %c0_i32_0 : i32, i32, i32
  }
}

</mosaic_0001>

<bundles_post_ra>
// kernel: tpu_custom_call.1
= control target key start
LH: loop header
LB: loop body
LE: loop exit
PB: predicated region body
PF: predicated region fallthrough
CT: control target
= control target key end

     0   :  { %vm48_vm0 = vcmask 261120   ;;  %s1909_s0 = inlined_call_operand.vmem [shape: f32[2,8,32], index: 0, kind: input, shape index: {}]   ;;  %s1910_s1 = inlined_call_operand.vmem [shape: f32[1,32], index: 1, kind: input, shape index: {}]   ;;  %s1911_s2 = inlined_call_operand.vmem [shape: f32[1,32], index: 2, kind: input, shape index: {}]   ;;  %s1912_s3 = inlined_call_operand.vmem [shape: f32[1,32], index: 3, kind: input, shape index: {}]   ;;  %s1913_s4 = inlined_call_operand.vmem [shape: f32[1,32], index: 4, kind: input, shape index: {}]   ;;  %s1914_s5 = inlined_call_operand.vmem [shape: f32[32,96], index: 5, kind: input, shape index: {}]   ;;  %s1915_s6 = inlined_call_operand.vmem [shape: f32[32,256], index: 6, kind: input, shape index: {}]   ;;  %s1916_s7 = inlined_call_operand.vmem [shape: f32[1,256], index: 7, kind: input, shape index: {}]   ;;  %s1917_s8 = inlined_call_operand.vmem [shape: f32[256,32], index: 8, kind: input, shape index: {}]   ;;  %s1918_s9 = inlined_call_operand.vmem [shape: f32[1,32], index: 9, kind: input, shape index: {}]   ;;  %s1919_s10 = inlined_call_operand.vmem [shape: f32[32,32], index: 10, kind: input, shape index: {}]   ;;  %s1920_s11 = inlined_call_operand.vmem [shape: f32[32,32], index: 11, kind: input, shape index: {}]   ;;  %s1921_s12 = inlined_call_operand.hbm [shape: f32[2,8,32], index: 12, kind: output, shape index: {}]  }
   0x1   :  { %v1542_v0 = vld [vmem:[%s1909_s0] sm:$0xff]  ;;  %v1547_v1 = vld [vmem:[%s1909_s0 + $0x8] sm:$0xff] }
   0x2   :  { %17 = vsyncpa [#allocation3], 0  ;;  %v49_v2 = vsel %vm48_vm0, %v1542_v0, 0.0  ;;  %v52_v3 = vsel %vm48_vm0, %v1547_v1, 0.0  ;;  %v1560_v21 = vld [vmem:[%s1910_s1] ss:$0 sm:$0xff] }
   0x3   :  { %50 = vadd.xlane.f32.xlu0 %v49_v2  ;;  %v1565_v23 = vld [vmem:[%s1911_s2] ss:$0 sm:$0xff]  ;;  %v135_v43 = vld [vmem:[%s1914_s5 + $0x8] sm:$0xff]  ;;  %v136_v44 = vld [vmem:[%s1914_s5 + $0x10] sm:$0xff]  ;;  %s1465_s18 = smov 32   ;;  %vm1468_vm1 = vmmov 0  }
   0x4   :  { %v134_v42 = vld [vmem:[%s1914_s5] sm:$0xff]  ;;  %v137_v46 = vld [vmem:[%s1914_s5 + $0x18] sm:$0xff]  ;;  %v1598_v48 = vld [vmem:[%s1919_s10 + $0x8] sm:$0xff]  ;;  %s1471_s14 = smov [#allocation2]  }
   0x5   :  { %v1272_v45 = vpack.c.bf16 %v135_v43, %v134_v42  ;;  %v1276_v47 = vpack.c.bf16 %v137_v46, %v136_v44  ;;  %v1604_v49 = vld [vmem:[%s1919_s10] sm:$0xff]  ;;  %v1609_v50 = vld [vmem:[%s1919_s10 + $0x10] sm:$0xff]  ;;  %v1616_v51 = vld [vmem:[%s1919_s10 + $0x18] sm:$0xff]  ;;  %s1102_s15 = sshll.u32 %s1471_s14, 4  ;;  %s1103_s15 = int_to_ptr.vmem [resolvable:$true] %s1102_s15 }
   0x6   :  { %v1115_v59 = vld [vmem:[%s1912_s3] ss:$0 sm:$0xff]  ;;  %s1467_s3 = smov 96   ;;  %vm1644_vm2 = vmpackc.low %vm48_vm0, %vm48_vm0  ;;  %s1441_s16 = scalar_lea.vmem %s1103_s15, 256 }
   0x7   :  { %53 = vadd.xlane.f32.xlu0 %v52_v3  ;;  %1273 = vmatprep.subr.bf16.mxu0 %v1272_v45  ;;  %v1116_v61 = vld [vmem:[%s1913_s4] ss:$0 sm:$0xff]  ;;  %s1470_s4 = smov 64   ;;  %p1442_p0 = scmp.ne.s32.totalorder %s1103_s15, %s1441_s16 }
   0x8   :  { %1275 = vmatpush3.bf16.msra.mxu0 %v1272_v45  ;;  %p1446_p1 = scmp.lt.s32.totalorder %s1103_s15, %s1103_s15  ;;  %p1447_p2 = scmp.lt.s32.totalorder %s1441_s16, %s1441_s16 }
   0x9   :  { %1277 = vmatprep.subr.bf16.mxu0 %v1276_v47 }
   0xa   :  { %p1448_p3 = por %p1447_p2, %p1446_p1 }
   0xc   :  { %1279 = vmatpush3.bf16.msra.mxu0 %v1276_v47  ;;  %p1449_p4 = pnand %p1448_p3, %p1442_p0 }
  0x90   :  { %v51_v4 = vpop.xlane.xlu0 %50 }
  0x91   :  { %v56_v5 = vmul.f32 0.03125, %v51_v4 }
  0x93   :  { %v58_v6 = vsub.f32 %v1542_v0, %v56_v5 }
  0x94   :  { %v54_v7 = vpop.xlane.xlu0 %53 }
  0x95   :  { %v57_v8 = vmul.f32 0.03125, %v54_v7  ;;  %v60_v9 = vmul.f32 %v58_v6, %v58_v6 }
  0x97   :  { %v59_v10 = vsub.f32 %v1547_v1, %v57_v8  ;;  %v62_v11 = vsel %vm48_vm0, %v60_v9, 0.0  ;;  %v1466_v8 = vmov 0.0|0.0  }
  0x98   :  { %63 = vadd.xlane.f32.xlu1 %v62_v11  ;;  %1280 = vmatprep.subr.bf16.mxu0 %v1466_v8 }
  0x99   :  { %v61_v12 = vmul.f32 %v59_v10, %v59_v10 }
  0x9b   :  { %v65_v13 = vsel %vm48_vm0, %v61_v12, 0.0 }
  0x9c   :  { %66 = vadd.xlane.f32.xlu1 %v65_v13 }
 0x125   :  { %v64_v14 = vpop.xlane.xlu1 %63 }
 0x126   :  { %v68_v15 = vmul.f32 0.03125, %v64_v14 }
 0x128   :  { %v70_v16 = vadd.f32 1e-05, %v68_v15 }
 0x129   :  { %v67_v17 = vpop.xlane.xlu1 %66 }
 0x12a   :  { %1405 = vrsqrt.f32 %v70_v16  ;;  %v69_v18 = vmul.f32 0.03125, %v67_v17 }
 0x12c   :  { %v71_v19 = vadd.f32 1e-05, %v69_v18 }
 0x12e   :  { %1407 = vrsqrt.f32 %v71_v19 }
 0x134   :  { %v1406_v20 = vpop.eup %1405 }
 0x135   :  { %v74_v22 = vmul.f32 %v1406_v20, %v58_v6 }
 0x137   :  { %v82_v24 = vmul.f32 %v1560_v21, %v74_v22 }
 0x138   :  { %v1408_v25 = vpop.eup %1407 }
 0x139   :  { %v1569_v26 = vadd.f32 %v1565_v23, %v82_v24  ;;  %v75_v27 = vmul.f32 %v1408_v25, %v59_v10  ;;  %v1469_v25 = vmov 0.0  }
 0x13b   :  { %v92_v28 = vsel %vm48_vm0, %v1569_v26, 0.0  ;;  %v83_v29 = vmul.f32 %v1560_v21, %v75_v27 }
 0x13c   :  { %93 = vadd.xlane.f32.xlu0 %v92_v28 }
 0x13d   :  { %v1575_v30 = vadd.f32 %v1565_v23, %v83_v29 }
 0x13f   :  { %v95_v31 = vsel %vm48_vm0, %v1575_v30, 0.0 }
 0x140   :  { %96 = vadd.xlane.f32.xlu1 %v95_v31 }
 0x1c9   :  { %v94_v32 = vpop.xlane.xlu0 %93 }
 0x1ca   :  { %v98_v33 = vmul.f32 0.03125, %v94_v32 }
 0x1cc   :  { %v100_v34 = vsub.f32 %v1569_v26, %v98_v33 }
 0x1cd   :  { %v97_v35 = vpop.xlane.xlu1 %96 }
 0x1ce   :  { %v99_v36 = vmul.f32 0.03125, %v97_v35  ;;  %v102_v37 = vmul.f32 %v100_v34, %v100_v34 }
 0x1d0   :  { %v101_v38 = vsub.f32 %v1575_v30, %v99_v36  ;;  %v104_v39 = vsel %vm48_vm0, %v102_v37, 0.0 }
 0x1d1   :  { %105 = vadd.xlane.f32.xlu0 %v104_v39 }
 0x1d2   :  { %v103_v40 = vmul.f32 %v101_v38, %v101_v38 }
 0x1d4   :  { %v107_v41 = vsel %vm48_vm0, %v103_v40, 0.0 }
 0x1d5   :  { %108 = vadd.xlane.f32.xlu1 %v107_v41 }
 0x1e6   :  { %231 = vrot.lane.b32.xlu1 %v1598_v48, %s1465_s18 }
 0x1e7   :  { %229 = vrot.lane.b32.xlu0 %v1604_v49, %s1465_s18 }
 0x1ea   :  { %233 = vrot.lane.b32.xlu1 %v1609_v50, %s1465_s18 }
 0x1ee   :  { %235 = vrot.lane.b32.xlu1 %v1616_v51, %s1465_s18 }
 0x25e   :  { %v106_v52 = vpop.xlane.xlu0 %105 }
 0x25f   :  { %v110_v53 = vmul.f32 0.03125, %v106_v52 }
 0x261   :  { %v112_v54 = vadd.f32 1e-05, %v110_v53 }
 0x262   :  { %v109_v55 = vpop.xlane.xlu1 %108  ;;  %v230_v10 = vpop.permute.xlu0 %229 }
 0x263   :  { %1409 = vrsqrt.f32 %v112_v54  ;;  %v111_v56 = vmul.f32 0.03125, %v109_v55 }
 0x265   :  { %v113_v57 = vadd.f32 1e-05, %v111_v56 }
 0x266   :  { %v232_v6 = vpop.permute.xlu1 %231 }
 0x267   :  { %1411 = vrsqrt.f32 %v113_v57 }
 0x26a   :  { %v234_v7 = vpop.permute.xlu1 %233 }
 0x26d   :  { %v1410_v58 = vpop.eup %1409 }
 0x26e   :  { %v116_v60 = vmul.f32 %v1410_v58, %v100_v34  ;;  %v236_v9 = vpop.permute.xlu1 %235 }
 0x270   :  { %v124_v62 = vmul.f32 %v1115_v59, %v116_v60  ;;  %v468_v60 = vld [vmem:[%s1920_s11 + $0x8] sm:$0xff] }
 0x271   :  { %v1412_v63 = vpop.eup %1411 }
 0x272   :  { %v117_v2 = vmul.f32 %v1412_v63, %v101_v38  ;;  %v132_v3 = vadd.f32 %v1116_v61, %v124_v62 }
 0x274   :  { %v125_v4 = vmul.f32 %v1115_v59, %v117_v2  ;;  %1214 = vmatprep.mubr.msk.f32.mxu0 %vm48_vm0, %v132_v3  ;;  %v467_v59 = vld [vmem:[%s1920_s11] sm:$0xff] }
 0x276   :  { %v133_v5 = vadd.f32 %v1116_v61, %v125_v4  ;;  %v1296_v61 = vpack.c.bf16 %v468_v60, %v467_v59 }
 0x278   :  { %1215 = vmatmul.mubr.msk.f32.vlgmr.msra.gmra.mrb[0].mxu0 %vm48_vm0, %v133_v5  ;;  %1297 = vmatprep.subr.bf16.mxu1 %v1296_v61 }
 0x279   :  { %1225 = vmatprep.mubr.msk.f32.mxu0 %vm1468_vm1, %v1469_v25  ;;  %1299 = vmatpush3.bf16.msra.mxu1 %v1296_v61 }
 0x34b   :  { %v1628_v11 = vpop.f32.mrb[0].mxu0 }
 0x34c   :  { %v1630_v12 = vpop.f32.mrb[1].mxu0  ;;  %v246_v17 = vmul.f32 %v1628_v11, %v232_v6  ;;  %v245_v18 = vmul.f32 %v1628_v11, %v230_v10  ;;  %v247_v22 = vmul.f32 %v1628_v11, %v234_v7  ;;  %v248_v24 = vmul.f32 %v1628_v11, %v236_v9 }
 0x34d   :  { %v243_v13 = vmul.f32 %v234_v7, %v1630_v12  ;;  %v244_v14 = vmul.f32 %v236_v9, %v1630_v12  ;;  %v241_v15 = vmul.f32 %v230_v10, %v1630_v12  ;;  %v242_v16 = vmul.f32 %v232_v6, %v1630_v12 }
 0x34e   :  { %v1375_v27 = vpack.i.bf16 %v246_v17, %v245_v18  ;;  %v1380_v28 = vpack.i.bf16 %v248_v24, %v247_v22  ;;  %v219_v42 = vmul.f32 0.35355338, %v1630_v12  ;;  %v220_v52 = vmul.f32 0.35355338, %v1628_v11 }
 0x34f   :  { %v1370_v19 = vpack.i.bf16 %v244_v14, %v243_v13  ;;  %v1365_v20 = vpack.i.bf16 %v242_v16, %v241_v15 }
 0x351   :  { %1371 = vrot.lane.b32.xlu1 %v1370_v19, %s1467_s3  ;;  %1366 = vrot.lane.b32.xlu0 %v1365_v20, %s1467_s3 }
 0x355   :  { %1381 = vrot.lane.b32.xlu1 %v1380_v28, %s1467_s3  ;;  %1376 = vrot.lane.b32.xlu0 %v1375_v27, %s1467_s3 }
 0x3c3   :  { %v1367_v29 = vpop.permute.xlu0 %1366  ;;  %v1372_v35 = vpop.permute.xlu1 %1371 }
 0x3c4   :  { %v1369_v31 = vunpack.i.h.bf16 %v1367_v29  ;;  %v1368_v32 = vunpack.i.l.bf16 %v1367_v29  ;;  %v1374_v36 = vunpack.i.h.bf16 %v1372_v35  ;;  %v1373_v37 = vunpack.i.l.bf16 %v1372_v35 }
 0x3c6   :  { %v1281_v34 = vpack.c.bf16 %v1369_v31, %v1368_v32  ;;  %v1285_v38 = vpack.c.bf16 %v1374_v36, %v1373_v37 }
 0x3c7   :  { %v1377_v39 = vpop.permute.xlu0 %1376  ;;  %v1382_v44 = vpop.permute.xlu1 %1381 }
 0x3c8   :  { %1283 = vmatpush3.bf16.xpose.msk.msra.mxu0 %vm1644_vm2, %v1281_v34  ;;  %v1379_v40 = vunpack.i.h.bf16 %v1377_v39  ;;  %v1378_v41 = vunpack.i.l.bf16 %v1377_v39  ;;  %v1384_v45 = vunpack.i.h.bf16 %v1382_v44  ;;  %v1383_v46 = vunpack.i.l.bf16 %v1382_v44 }
 0x3c9   :  { %1284 = vmatprep.subr.bf16.mxu0 %v1466_v8 }
 0x3ca   :  { %v1289_v43 = vpack.c.bf16 %v1379_v40, %v1378_v41  ;;  %v1293_v47 = vpack.c.bf16 %v1384_v45, %v1383_v46 }
 0x3d0   :  { %1287 = vmatpush3.bf16.xpose.msk.msra.mxu0 %vm1644_vm2, %v1285_v38 }
 0x3d1   :  { %1288 = vmatprep.subr.bf16.mxu0 %v1466_v8 }
 0x3d7   :  { %1226 = vmatmul.mubr.msk.f32.vlgmr.msra.gmra.mrb[2].mxu0 %vm48_vm0, %v219_v42 }
 0x3d8   :  { %1291 = vmatpush3.bf16.xpose.msk.msra.mxu0 %vm1644_vm2, %v1289_v43  ;;  %1236 = vmatprep.mubr.msk.f32.mxu0 %vm1468_vm1, %v1469_v25 }
 0x3d9   :  { %1292 = vmatprep.subr.bf16.mxu0 %v1466_v8 }
 0x3e0   :  { %1295 = vmatpush3.bf16.xpose.msk.msra.mxu0 %vm1644_vm2, %v1293_v47 }
 0x3e1   :  { %1304 = vmatprep.subr.bf16.mxu0 %v1466_v8 }
 0x3e7   :  { %1237 = vmatmul.mubr.msk.f32.vlgmr.msra.gmra.mrb[4].mxu0 %vm48_vm0, %v220_v52 }
 0x3e8   :  { %1258 = vmatprep.mubr.msk.f32.mxu0 %vm1468_vm1, %v1469_v25 }
 0x4aa   :  { %v358_v53 = vpop.f32.mrb[2].mxu0 }
 0x4ab   :  { %v1227_v54 = vpop.f32.mrb[3].mxu0  ;;  %v455_v55 = vsel %vm48_vm0, %v358_v53, -inf }
 0x4ac   :  { %456 = vmax.xlane.f32.xlu0 %v455_v55  ;;  %v735_v55 = vadd.f32 %v1575_v30, %v1547_v1 }
 0x4ba   :  { %v451_v56 = vpop.f32.mrb[4].mxu0 }
 0x4bb   :  { %v1238_v57 = vpop.f32.mrb[5].mxu0  ;;  %v458_v58 = vsel %vm48_vm0, %v451_v56, -inf }
 0x4bc   :  { %459 = vmax.xlane.f32.xlu1 %v458_v58 }
 0x4c2   :  { %249 = vrot.lane.b32.xlu0 %v1604_v49, %s1470_s4  ;;  %v469_v49 = vld [vmem:[%s1920_s11 + $0x10] sm:$0xff] }
 0x4c6   :  { %253 = vrot.lane.b32.xlu0 %v1609_v50, %s1470_s4 }
 0x4cd   :  { %251 = vrot.lane.b32.xlu1 %v1598_v48, %s1470_s4  ;;  %v470_v48 = vld [vmem:[%s1920_s11 + $0x18] sm:$0xff] }
 0x4ce   :  { %v1300_v50 = vpack.c.bf16 %v470_v48, %v469_v49 }
 0x4d0   :  { %1301 = vmatprep.subr.bf16.mxu1 %v1300_v50 }
 0x4d1   :  { %255 = vrot.lane.b32.xlu1 %v1616_v51, %s1470_s4  ;;  %1303 = vmatpush3.bf16.msra.mxu1 %v1300_v50 }
 0x4d2   :  { %1310 = vmatprep.subr.bf16.mxu1 %v1466_v8 }
 0x539   :  { %v457_v62 = vpop.xlane.xlu0 %456 }
 0x53a   :  { %v461_v63 = vsub.f32 %v358_v53, %v457_v62 }
 0x53c   :  { %v463_v2 = vmul.f32 1.442695, %v461_v63 }
 0x53d   :  { %v250_v3 = vpop.permute.xlu0 %249 }
 0x53e   :  { %1413 = vpow2.f32 %v463_v2  ;;  %v261_v9 = vmul.f32 %v250_v3, %v1630_v12  ;;  %v265_v17 = vmul.f32 %v1628_v11, %v250_v3 }
 0x541   :  { %v254_v13 = vpop.permute.xlu0 %253 }
 0x542   :  { %v263_v18 = vmul.f32 %v254_v13, %v1630_v12  ;;  %v267_v27 = vmul.f32 %v1628_v11, %v254_v13  ;;  %v773_v13 = vld [vmem:[%s1915_s6 + $0x28] sm:$0xff] }
 0x548   :  { %v1414_v51 = vpop.eup %1413 }
 0x549   :  { %1247 = vmatprep.mubr.msk.f32.mxu1 %vm48_vm0, %v1414_v51  ;;  %v460_v4 = vpop.xlane.xlu1 %459 }
 0x54a   :  { %v462_v5 = vsub.f32 %v451_v56, %v460_v4  ;;  %v734_v56 = vadd.f32 %v1569_v26, %v1542_v0  ;;  %v769_v4 = vld [vmem:[%s1915_s6 + $0x8] sm:$0xff] }
 0x54c   :  { %v465_v6 = vmul.f32 1.442695, %v462_v5  ;;  %v771_v5 = vld [vmem:[%s1915_s6 + $0x18] sm:$0xff] }
 0x54d   :  { %v252_v7 = vpop.permute.xlu1 %251 }
 0x54e   :  { %1415 = vpow2.f32 %v465_v6  ;;  %v262_v10 = vmul.f32 %v252_v7, %v1630_v12  ;;  %v266_v14 = vmul.f32 %v1628_v11, %v252_v7  ;;  %v1316_v6 = vpack.c.bf16 %v771_v5, %v769_v4  ;;  %v768_v7 = vld [vmem:[%s1915_s6] sm:$0xff]  ;;  %v1008_v5 = vld [vmem:[%s1917_s8 + $0xe8] sm:$0xff] }
 0x54f   :  { %v1007_v4 = vld [vmem:[%s1917_s8 + $0xe0] sm:$0xff] }
 0x550   :  { %v1385_v15 = vpack.i.bf16 %v262_v10, %v261_v9  ;;  %v1395_v20 = vpack.i.bf16 %v266_v14, %v265_v17  ;;  %v770_v9 = vld [vmem:[%s1915_s6 + $0x10] sm:$0xff]  ;;  %v775_v14 = vld [vmem:[%s1915_s6 + $0x38] sm:$0xff] }
 0x551   :  { %v256_v16 = vpop.permute.xlu1 %255  ;;  %v1318_v10 = vpack.c.bf16 %v770_v9, %v768_v7  ;;  %v774_v17 = vld [vmem:[%s1915_s6 + $0x30] sm:$0xff]  ;;  %v991_v7 = vld [vmem:[%s1917_s8 + $0x60] sm:$0xff]  ;;  %v992_v9 = vld [vmem:[%s1917_s8 + $0x68] sm:$0xff] }
 0x552   :  { %v264_v19 = vmul.f32 %v256_v16, %v1630_v12  ;;  %1386 = vrot.lane.b32.xlu0 %v1385_v15, %s1470_s4  ;;  %v268_v22 = vmul.f32 %v1628_v11, %v256_v16  ;;  %v772_v15 = vld [vmem:[%s1915_s6 + $0x20] sm:$0xff]  ;;  %v1320_v16 = vpack.c.bf16 %v775_v14, %v773_v13  ;;  %v1009_v13 = vld [vmem:[%s1917_s8 + $0xf0] sm:$0xff]  ;;  %v1010_v14 = vld [vmem:[%s1917_s8 + $0xf8] sm:$0xff] }
 0x554   :  { %v1390_v24 = vpack.i.bf16 %v264_v19, %v263_v18  ;;  %v1400_v29 = vpack.i.bf16 %v268_v22, %v267_v27  ;;  %v1322_v18 = vpack.c.bf16 %v774_v17, %v772_v15  ;;  %v1352_v15 = vpack.c.bf16 %v1010_v14, %v1009_v13  ;;  %v994_v17 = vld [vmem:[%s1917_s8 + $0x78] sm:$0xff] }
 0x556   :  { %1396 = vrot.lane.b32.xlu0 %v1395_v20, %s1470_s4  ;;  %1391 = vrot.lane.b32.xlu1 %v1390_v24, %s1470_s4 }
 0x558   :  { %v1416_v28 = vpop.eup %1415 }
 0x559   :  { %1248 = vmatmul.mubr.msk.f32.vlgmr.msra.gmra.mrb[0].mxu1 %vm48_vm0, %v1416_v28 }
 0x55a   :  { %1401 = vrot.lane.b32.xlu1 %v1400_v29, %s1470_s4  ;;  %1269 = vmatprep.mubr.msk.f32.mxu1 %vm1468_vm1, %v1469_v25 }
 0x5c4   :  { %v1387_v12 = vpop.permute.xlu0 %1386 }
 0x5c5   :  { %v1389_v31 = vunpack.i.h.bf16 %v1387_v12  ;;  %v1388_v32 = vunpack.i.l.bf16 %v1387_v12 }
 0x5c7   :  { %v1305_v33 = vpack.c.bf16 %v1389_v31, %v1388_v32 }
 0x5c8   :  { %v1397_v34 = vpop.permute.xlu0 %1396  ;;  %v1392_v35 = vpop.permute.xlu1 %1391 }
 0x5c9   :  { %v1399_v11 = vunpack.i.h.bf16 %v1397_v34  ;;  %v1398_v36 = vunpack.i.l.bf16 %v1397_v34  ;;  %v1394_v37 = vunpack.i.h.bf16 %v1392_v35  ;;  %v1393_v38 = vunpack.i.l.bf16 %v1392_v35  ;;  %1306 = vmatpush3.bf16.msra.mxu0 %v1305_v33 }
 0x5ca   :  { %1307 = vmatprep.subr.bf16.mxu0 %v1466_v8 }
 0x5cb   :  { %v1311_v39 = vpack.c.bf16 %v1399_v11, %v1398_v36  ;;  %v1308_v40 = vpack.c.bf16 %v1394_v37, %v1393_v38  ;;  %v995_v36 = vld [vmem:[%s1917_s8 + $0x80] sm:$0xff]  ;;  %v996_v37 = vld [vmem:[%s1917_s8 + $0x88] sm:$0xff] }
 0x5cc   :  { %v1402_v41 = vpop.permute.xlu1 %1401  ;;  %v1324_v38 = vpack.c.bf16 %v996_v37, %v995_v36 }
 0x5cd   :  { %v1404_v42 = vunpack.i.h.bf16 %v1402_v41  ;;  %v1403_v43 = vunpack.i.l.bf16 %v1402_v41  ;;  %1309 = vmatpush3.bf16.msra.mxu0 %v1308_v40  ;;  %1312 = vmatpush3.bf16.msra.mxu1 %v1311_v39  ;;  %v979_v39 = vld [vmem:[%s1917_s8] sm:$0xff]  ;;  %v998_v40 = vld [vmem:[%s1917_s8 + $0x98] sm:$0xff] }
 0x5ce   :  { %1313 = vmatprep.subr.bf16.mxu1 %v1466_v8  ;;  %1317 = vmatprep.subr.bf16.mxu0 %v1316_v6  ;;  %v1348_v6 = vpack.c.bf16 %v1008_v5, %v1007_v4 }
 0x5cf   :  { %v1314_v44 = vpack.c.bf16 %v1404_v42, %v1403_v43  ;;  %v981_v42 = vld [vmem:[%s1917_s8 + $0x10] sm:$0xff]  ;;  %v982_v43 = vld [vmem:[%s1917_s8 + $0x18] sm:$0xff] }
 0x5d1   :  { %1315 = vmatpush3.bf16.msra.mxu1 %v1314_v44  ;;  %v1330_v44 = vpack.c.bf16 %v982_v43, %v981_v42 }
 0x5d2   :  { %1325 = vmatprep.subr.bf16.mxu1 %v1324_v38 }
 0x62c   :  { %v1249_v45 = vpop.f32.mrb[0].mxu1 }
 0x62d   :  { %1417 = vrcp.f32 %v1249_v45  ;;  %v543_v46 = vpop.f32.mrb[1].mxu1  ;;  %v999_v45 = vld [vmem:[%s1917_s8 + $0xa0] sm:$0xff] }
 0x62e   :  { %1419 = vrcp.f32 %v543_v46  ;;  %v1000_v46 = vld [vmem:[%s1917_s8 + $0xa8] sm:$0xff] }
 0x637   :  { %v1418_v47 = vpop.eup %1417 }
 0x638   :  { %v1420_v52 = vpop.eup %1419  ;;  %v555_v53 = vmul.f32 %v1418_v47, %v1416_v28  ;;  %v1332_v47 = vpack.c.bf16 %v1000_v46, %v999_v45 }
 0x639   :  { %v554_v54 = vmul.f32 %v1420_v52, %v1414_v51  ;;  %v983_v52 = vld [vmem:[%s1917_s8 + $0x20] sm:$0xff] }
 0x63a   :  { %1270 = vmatmul.mubr.msk.f32.vlgmr.msra.gmra.mrb[2].mxu1 %vm48_vm0, %v555_v53  ;;  %v984_v53 = vld [vmem:[%s1917_s8 + $0x28] sm:$0xff] }
 0x63b   :  { %1259 = vmatmul.mubr.msk.f32.vlgmr.msra.gmra.mrb[6].mxu0 %vm48_vm0, %v554_v54  ;;  %v1334_v54 = vpack.c.bf16 %v984_v53, %v983_v52 }
 0x63c   :  { %858 = vmatprep.mubr.f32.mxu0 %v1469_v25  ;;  %1319 = vmatpush1.bf16.msra.mxu0 %v1318_v10  ;;  %v1350_v10 = vpack.c.bf16 %v992_v9, %v991_v7 }
 0x63d   :  { %1321 = vmatprep.subr.bf16.mxu0 %v1320_v16  ;;  %v993_v16 = vld [vmem:[%s1917_s8 + $0x70] sm:$0xff] }
 0x640   :  { %1323 = vmatpush1.bf16.msra.mxu0 %v1322_v18  ;;  %v1354_v18 = vpack.c.bf16 %v994_v17, %v993_v16 }
 0x70d   :  { %v730_v8 = vpop.f32.mrb[2].mxu1 }
 0x70e   :  { %v1716_v57 = vadd.f32 %v735_v55, %v730_v8  ;;  %v641_v58 = vpop.f32.mrb[6].mxu0  ;;  %v1271_v59 = vpop.f32.mrb[3].mxu1  ;;  %v1001_v55 = vld [vmem:[%s1917_s8 + $0xb0] sm:$0xff]  ;;  %v1002_v8 = vld [vmem:[%s1917_s8 + $0xb8] sm:$0xff] }
 0x70f   :  { %v1718_v60 = vadd.f32 %v734_v56, %v641_v58  ;;  %v1260_v61 = vpop.f32.mrb[7].mxu0  ;;  %v1336_v56 = vpack.c.bf16 %v1002_v8, %v1001_v55  ;;  %v985_v58 = vld [vmem:[%s1917_s8 + $0x30] sm:$0xff]  ;;  %v986_v59 = vld [vmem:[%s1917_s8 + $0x38] sm:$0xff] }
 0x710   :  { %v741_v49 = vsel %vm48_vm0, %v1716_v57, 0.0  ;;  %v1338_v61 = vpack.c.bf16 %v986_v59, %v985_v58 }
 0x711   :  { %742 = vadd.xlane.f32.xlu1 %v741_v49  ;;  %v738_v48 = vsel %vm48_vm0, %v1718_v60, 0.0  ;;  %v1003_v49 = vld [vmem:[%s1917_s8 + $0xc0] sm:$0xff] }
 0x712   :  { %739 = vadd.xlane.f32.xlu0 %v738_v48  ;;  %v1004_v48 = vld [vmem:[%s1917_s8 + $0xc8] sm:$0xff] }
 0x79e   :  { %v743_v1 = vpop.xlane.xlu1 %742 }
 0x79f   :  { %v745_v30 = vmul.f32 0.03125, %v743_v1  ;;  %v740_v50 = vpop.xlane.xlu0 %739  ;;  %v1340_v1 = vpack.c.bf16 %v1004_v48, %v1003_v49 }
 0x7a0   :  { %v744_v62 = vmul.f32 0.03125, %v740_v50  ;;  %v988_v50 = vld [vmem:[%s1917_s8 + $0x48] sm:$0xff] }
 0x7a1   :  { %v747_v0 = vsub.f32 %v1716_v57, %v745_v30  ;;  %v987_v30 = vld [vmem:[%s1917_s8 + $0x40] sm:$0xff] }
 0x7a2   :  { %v746_v26 = vsub.f32 %v1718_v60, %v744_v62  ;;  %v1342_v62 = vpack.c.bf16 %v988_v50, %v987_v30 }
 0x7a3   :  { %v749_v51 = vmul.f32 %v747_v0, %v747_v0 }
 0x7a4   :  { %v748_v63 = vmul.f32 %v746_v26, %v746_v26 }
 0x7a5   :  { %v753_v3 = vsel %vm48_vm0, %v749_v51, 0.0  ;;  %v990_v51 = vld [vmem:[%s1917_s8 + $0x58] sm:$0xff] }
 0x7a6   :  { %v750_v2 = vsel %vm48_vm0, %v748_v63, 0.0 }
 0x7a7   :  { %751 = vadd.xlane.f32.xlu0 %v750_v2  ;;  %v989_v2 = vld [vmem:[%s1917_s8 + $0x50] sm:$0xff] }
 0x7ab   :  { %754 = vadd.xlane.f32.xlu0 %v753_v3  ;;  %v1346_v3 = vpack.c.bf16 %v990_v51, %v989_v2 }
 0x834   :  { %v752_v19 = vpop.xlane.xlu0 %751 }
 0x835   :  { %v756_v20 = vmul.f32 0.03125, %v752_v19  ;;  %v778_v19 = vlaneseq }
 0x837   :  { %v758_v22 = vadd.f32 1e-05, %v756_v20  ;;  %v779_v20 = vshrl.u32 %v778_v19, 7 }
 0x838   :  { %v755_v24 = vpop.xlane.xlu0 %754 }
 0x839   :  { %1421 = vrsqrt.f32 %v758_v22  ;;  %v757_v27 = vmul.f32 0.03125, %v755_v24  ;;  %v780_v22 = vsub.s32 0, %v779_v20  ;;  %v776_v24 = vld [vmem:[%s1916_s7] sm:$0x3] }
 0x83b   :  { %v759_v28 = vadd.f32 1e-05, %v757_v27  ;;  %v784_v27 = vsub.s32 1, %v779_v20 }
 0x83d   :  { %1423 = vrsqrt.f32 %v759_v28  ;;  %v781_v28 = vrot.slane %v776_v24, %v780_v22 }
 0x843   :  { %v1422_v29 = vpop.eup %1421 }
 0x844   :  { %v762_v12 = vmul.f32 %v1422_v29, %v746_v26  ;;  %v1006_v26 = vld [vmem:[%s1917_s8 + $0xd8] sm:$0xff]  ;;  %v785_v29 = vrot.slane %v776_v24, %v784_v27 }
 0x846   :  { %v764_v31 = vmul.f32 %v1560_v21, %v762_v12 }
 0x847   :  { %v1424_v32 = vpop.eup %1423 }
 0x848   :  { %v766_v33 = vadd.f32 %v1565_v23, %v764_v31  ;;  %v763_v34 = vmul.f32 %v1424_v32, %v747_v0  ;;  %v1005_v0 = vld [vmem:[%s1917_s8 + $0xd0] sm:$0xff] }
 0x849   :  { %v1344_v63 = vpack.c.bf16 %v1006_v26, %v1005_v0 }
 0x84a   :  { %1133 = vmatmul.mubr.msk.f32.vlgmr.msra.gmra.mrb[8].mxu0 %vm48_vm0, %v766_v33  ;;  %v765_v35 = vmul.f32 %v1560_v21, %v763_v34  ;;  %v980_v21 = vld [vmem:[%s1917_s8 + $0x8] sm:$0xff] }
 0x84b   :  { %864 = vmatprep.mubr.f32.mxu0 %v1469_v25  ;;  %v997_v25 = vld [vmem:[%s1917_s8 + $0x90] sm:$0xff] }
 0x84c   :  { %v767_v11 = vadd.f32 %v1565_v23, %v765_v35  ;;  %v1326_v23 = vpack.c.bf16 %v980_v21, %v979_v39  ;;  %v1328_v41 = vpack.c.bf16 %v998_v40, %v997_v25 }
 0x84e   :  { %1134 = vmatmul.mubr.msk.f32.gmra.mrb[10].mxu0 %vm48_vm0, %v767_v11  ;;  %1327 = vmatpush3.bf16.msra.mxu1 %v1326_v23 }
 0x84f   :  { %1329 = vmatprep.subr.bf16.mxu1 %v1328_v41 }
 0x852   :  { %1331 = vmatpush3.bf16.msra.mxu1 %v1330_v44 }
 0x853   :  { %1333 = vmatprep.subr.bf16.mxu1 %v1332_v47 }
 0x856   :  { %1335 = vmatpush3.bf16.msra.mxu1 %v1334_v54 }
 0x857   :  { %1337 = vmatprep.subr.bf16.mxu1 %v1336_v56 }
 0x85a   :  { %1339 = vmatpush3.bf16.msra.mxu1 %v1338_v61 }
 0x85b   :  { %1341 = vmatprep.subr.bf16.mxu1 %v1340_v1 }
 0x85e   :  { %1343 = vmatpush3.bf16.msra.mxu1 %v1342_v62 }
 0x85f   :  { %1345 = vmatprep.subr.bf16.mxu1 %v1344_v63 }
 0x862   :  { %1347 = vmatpush3.bf16.msra.mxu1 %v1346_v3 }
 0x863   :  { %1349 = vmatprep.subr.bf16.mxu1 %v1348_v6 }
 0x866   :  { %1351 = vmatpush3.bf16.msra.mxu1 %v1350_v10 }
 0x867   :  { %1353 = vmatprep.subr.bf16.mxu1 %v1352_v15 }
 0x86a   :  { %1355 = vmatpush3.bf16.msra.mxu1 %v1354_v18 }
 0x91d   :  { %v860_v12 = vpop.f32.mrb[8].mxu0 }
 0x91e   :  { %v1858_v31 = vadd.f32 %v860_v12, %v781_v28  ;;  %v862_v32 = vpop.f32.mrb[9].mxu0 }
 0x91f   :  { %v1860_v33 = vadd.f32 %v862_v32, %v785_v29 }
 0x920   :  { %v1863_v34 = vmul.f32 0.70710677, %v1858_v31 }
 0x921   :  { %v1866_v35 = vmul.f32 0.70710677, %v1860_v33  ;;  %v866_v11 = vpop.f32.mrb[10].mxu0 }
 0x922   :  { %v879_v36 = vand.u32 2147483647, %v1863_v34  ;;  %v1869_v37 = vadd.f32 %v866_v11, %v781_v28  ;;  %v868_v38 = vpop.f32.mrb[11].mxu0  ;;  %vm959_vm3 = vcmp.lt.f32.partialorder %v1863_v34, 0.0 }
 0x923   :  { %v880_v39 = vand.u32 2147483647, %v1866_v35  ;;  %v1872_v21 = vadd.f32 %v868_v38, %v785_v29  ;;  %vm960_vm4 = vcmp.lt.f32.partialorder %v1866_v35, 0.0 }
 0x924   :  { %v883_v23 = vmul.f32 0.3275911, %v879_v36  ;;  %v1875_v25 = vmul.f32 0.70710677, %v1869_v37  ;;  %v935_v54 = vsub.f32 0.0, %v879_v36 }
 0x925   :  { %v884_v40 = vmul.f32 0.3275911, %v880_v39  ;;  %v1878_v41 = vmul.f32 0.70710677, %v1872_v21  ;;  %v936_v55 = vsub.f32 0.0, %v880_v39 }
 0x926   :  { %v887_v42 = vadd.f32 1.0, %v883_v23  ;;  %v881_v43 = vand.u32 2147483647, %v1875_v25  ;;  %v939_v56 = vmul.f32 %v935_v54, %v879_v36  ;;  %vm961_vm5 = vcmp.lt.f32.partialorder %v1875_v25, 0.0  ;;  %v1135_v25 = vld [vmem:[%s1918_s9] ss:$0 sm:$0xff] }
 0x927   :  { %v888_v44 = vadd.f32 1.0, %v884_v40  ;;  %v882_v45 = vand.u32 2147483647, %v1878_v41  ;;  %v940_v49 = vmul.f32 %v936_v55, %v880_v39  ;;  %vm962_vm6 = vcmp.lt.f32.partialorder %v1878_v41, 0.0 }
 0x928   :  { %1425 = vrcp.f32 %v887_v42  ;;  %v885_v46 = vmul.f32 0.3275911, %v881_v43  ;;  %v937_v58 = vsub.f32 0.0, %v881_v43  ;;  %v943_v62 = vmul.f32 1.442695, %v939_v56 }
 0x929   :  { %1427 = vrcp.f32 %v888_v44  ;;  %v886_v47 = vmul.f32 0.3275911, %v882_v45  ;;  %v938_v48 = vsub.f32 0.0, %v882_v45  ;;  %v945_v51 = vmul.f32 1.442695, %v940_v49 }
 0x92a   :  { %v889_v52 = vadd.f32 1.0, %v885_v46  ;;  %v941_v0 = vmul.f32 %v937_v58, %v881_v43 }
 0x92b   :  { %v890_v53 = vadd.f32 1.0, %v886_v47  ;;  %v942_v3 = vmul.f32 %v938_v48, %v882_v45 }
 0x92c   :  { %1429 = vrcp.f32 %v889_v52  ;;  %v947_v10 = vmul.f32 1.442695, %v941_v0 }
 0x92d   :  { %1431 = vrcp.f32 %v890_v53  ;;  %v949_v16 = vmul.f32 1.442695, %v942_v3 }
 0x92e   :  { %1433 = vpow2.f32 %v943_v62 }
 0x92f   :  { %1435 = vpow2.f32 %v945_v51  ;;  %v872_v51 = vmul.f32 0.5, %v1860_v33  ;;  %v873_v33 = vmul.f32 0.5, %v1869_v37 }
 0x930   :  { %1437 = vpow2.f32 %v947_v10 }
 0x931   :  { %1439 = vpow2.f32 %v949_v16 }
 0x932   :  { %v1426_v8 = vpop.eup %1425 }
 0x933   :  { %v1428_v59 = vpop.eup %1427  ;;  %v899_v61 = vmul.f32 1.0614054, %v1426_v8 }
 0x934   :  { %v900_v1 = vmul.f32 1.0614054, %v1428_v59 }
 0x935   :  { %v903_v30 = vadd.f32 -1.4531521, %v899_v61 }
 0x936   :  { %v1430_v50 = vpop.eup %1429  ;;  %v904_v26 = vadd.f32 -1.4531521, %v900_v1 }
 0x937   :  { %v1432_v63 = vpop.eup %1431  ;;  %v907_v2 = vmul.f32 %v1426_v8, %v903_v30  ;;  %v901_v4 = vmul.f32 1.0614054, %v1430_v50 }
 0x938   :  { %v908_v5 = vmul.f32 %v1428_v59, %v904_v26  ;;  %v902_v6 = vmul.f32 1.0614054, %v1432_v63  ;;  %v1434_v42 = vpop.eup %1433 }
 0x939   :  { %v911_v7 = vadd.f32 1.4214138, %v907_v2  ;;  %v905_v9 = vadd.f32 -1.4531521, %v901_v4  ;;  %v1436_v45 = vpop.eup %1435 }
 0x93a   :  { %v912_v13 = vadd.f32 1.4214138, %v908_v5  ;;  %v906_v14 = vadd.f32 -1.4531521, %v902_v6  ;;  %v1438_v56 = vpop.eup %1437 }
 0x93b   :  { %v915_v15 = vmul.f32 %v1426_v8, %v911_v7  ;;  %v909_v17 = vmul.f32 %v1430_v50, %v905_v9  ;;  %v1440_v49 = vpop.eup %1439  ;;  %v874_v9 = vmul.f32 0.5, %v1872_v21 }
 0x93c   :  { %v916_v18 = vmul.f32 %v1428_v59, %v912_v13  ;;  %v910_v19 = vmul.f32 %v1432_v63, %v906_v14 }
 0x93d   :  { %v919_v20 = vadd.f32 -0.28449672, %v915_v15  ;;  %v913_v22 = vadd.f32 1.4214138, %v909_v17 }
 0x93e   :  { %v920_v24 = vadd.f32 -0.28449672, %v916_v18  ;;  %v914_v27 = vadd.f32 1.4214138, %v910_v19 }
 0x93f   :  { %v923_v28 = vmul.f32 %v1426_v8, %v919_v20  ;;  %v917_v29 = vmul.f32 %v1430_v50, %v913_v22 }
 0x940   :  { %v924_v12 = vmul.f32 %v1428_v59, %v920_v24  ;;  %v918_v32 = vmul.f32 %v1432_v63, %v914_v27 }
 0x941   :  { %v927_v11 = vadd.f32 0.2548296, %v923_v28  ;;  %v921_v36 = vadd.f32 -0.28449672, %v917_v29 }
 0x942   :  { %v928_v38 = vadd.f32 0.2548296, %v924_v12  ;;  %v922_v39 = vadd.f32 -0.28449672, %v918_v32 }
 0x943   :  { %v931_v23 = vmul.f32 %v1426_v8, %v927_v11  ;;  %v925_v40 = vmul.f32 %v1430_v50, %v921_v36 }
 0x944   :  { %v932_v43 = vmul.f32 %v1428_v59, %v928_v38  ;;  %v926_v44 = vmul.f32 %v1432_v63, %v922_v39 }
 0x945   :  { %v951_v46 = vmul.f32 %v1434_v42, %v931_v23  ;;  %v929_v47 = vadd.f32 0.2548296, %v925_v40 }
 0x946   :  { %v952_v52 = vmul.f32 %v1436_v45, %v932_v43  ;;  %v930_v53 = vadd.f32 0.2548296, %v926_v44 }
 0x947   :  { %v955_v54 = vsub.f32 1.0, %v951_v46  ;;  %v933_v55 = vmul.f32 %v1430_v50, %v929_v47 }
 0x948   :  { %v956_v58 = vsub.f32 1.0, %v952_v52  ;;  %v934_v61 = vmul.f32 %v1432_v63, %v930_v53  ;;  %v871_v63 = vmul.f32 0.5, %v1858_v31 }
 0x949   :  { %v963_v48 = vsub.f32 0.0, %v955_v54  ;;  %v953_v1 = vmul.f32 %v1438_v56, %v933_v55 }
 0x94a   :  { %v964_v8 = vsub.f32 0.0, %v956_v58  ;;  %v954_v30 = vmul.f32 %v1440_v49, %v934_v61 }
 0x94b   :  { %v967_v62 = vsel %vm959_vm3, %v963_v48, %v955_v54  ;;  %v957_v59 = vsub.f32 1.0, %v953_v1 }
 0x94c   :  { %v971_v0 = vadd.f32 1.0, %v967_v62  ;;  %v968_v26 = vsel %vm960_vm4, %v964_v8, %v956_v58  ;;  %v958_v2 = vsub.f32 1.0, %v954_v30 }
 0x94d   :  { %v972_v50 = vadd.f32 1.0, %v968_v26  ;;  %v965_v3 = vsub.f32 0.0, %v957_v59 }
 0x94e   :  { %v966_v4 = vsub.f32 0.0, %v958_v2  ;;  %v975_v6 = vmul.f32 %v971_v0, %v871_v63 }
 0x94f   :  { %v976_v34 = vmul.f32 %v972_v50, %v872_v51  ;;  %v969_v5 = vsel %vm961_vm5, %v965_v3, %v957_v59 }
 0x950   :  { %v970_v7 = vsel %vm962_vm6, %v966_v4, %v958_v2  ;;  %v973_v35 = vadd.f32 1.0, %v969_v5 }
 0x951   :  { %1082 = vmatprep.mubr.f32.mxu1 %v976_v34  ;;  %v974_v10 = vadd.f32 1.0, %v970_v7 }
 0x952   :  { %1083 = vmatmul.mubr.f32.vlgmr.msra.gmra.mrb[4].mxu1 %v975_v6  ;;  %v977_v14 = vmul.f32 %v973_v35, %v873_v33 }
 0x953   :  { %v978_v13 = vmul.f32 %v974_v10, %v874_v9 }
 0x955   :  { %1087 = vmatprep.mubr.f32.mxu1 %v978_v13 }
 0x956   :  { %1088 = vmatmul.mubr.f32.gmra.mrb[6].mxu1 %v977_v14 }
 0xa25   :  { %v1200_v31 = vpop.f32.mrb[4].mxu1 }
 0xa26   :  { %v1201_v41 = vpop.f32.mrb[5].mxu1 }
 0xa27   :  { %v1202_v15 = vadd.f32 %v1201_v41, %v1200_v31 }
 0xa29   :  { %v1085_v16 = vadd.f32 %v1202_v15, %v1135_v25  ;;  %v1203_v17 = vpop.f32.mrb[6].mxu1 }
 0xa2a   :  { %v1204_v18 = vpop.f32.mrb[7].mxu1 }
 0xa2b   :  { %v1093_v21 = vadd.f32 %v1085_v16, %v1718_v60  ;;  %v1205_v19 = vadd.f32 %v1204_v18, %v1203_v17 }
 0xa2d   :  { %1095 = vst.msk [vmem:[#allocation2] sm:$0xff] %vm48_vm0, %v1093_v21  ;;  %v1090_v37 = vadd.f32 %v1205_v19, %v1135_v25 }
 0xa2f   :  { %v1094_v20 = vadd.f32 %v1090_v37, %v1716_v57 }
 0xa31   :  { %1096 = vst.msk [vmem:[#allocation2 + $0x8] sm:$0xff] %vm48_vm0, %v1094_v20 }
 0xa32   :  { %1452 = shalt.err (!%p1449_p4)
}
 0xa33   :  { %s1453_s18 = scalar_lea.hbm %s1921_s12, 256 }
 0xa34   :  { %p1454_p5 = scmp.ne.s32.totalorder %s1921_s12, %s1453_s18  ;;  %p1457_p6 = scmp.lt.u32.totalorder %s1453_s18, %s1921_s12 }
 0xa36   :  { %p1459_p7 = pnand %p1457_p6, %p1454_p5 }
 0xa38   :  { %1462 = shalt.err (!%p1459_p7)
}
 0xa39   :  { %s1472_s22 = smov 128   ;;  %s1473_s23 = smov 8  }
 0xa3a   :  { %1108 = dma.vmem_to_hbm [thread:$0]  %s1103_s15, 256, %s1921_s12, [#allocation3], %s1472_s22, %s1472_s22, %s1473_s23  }
 0xa3b   :  { %1463 = dma.done.wait [#allocation3], 256  }
 0xa3c   :  { %1464 = vsyncadd [#allocation3], 4294967040 }
 0xa3d   :  { %1112 = vsyncpa [#allocation3], 1 }

</bundles_post_ra>
